<compile_context>
chip_gen: v5e
topology: v5e:2x2
jax: 0.10.0
libtpu: 0.0.40
codegen_flags: <defaults>
</compile_context>

<pallas_src>
import functools

import jax
import jax.numpy as jnp
from jax import lax
from jax.experimental import pallas as pl
from jax.experimental.pallas import tpu as pltpu


def _round_up(v, mult):
    return ((v + mult - 1) // mult) * mult


# --------------------------------------------------------------------------
# roll-direction probe (pins down pltpu.roll's lane-rotation sign once, so the
# conv-tap shift direction is correct regardless of the library convention)
# --------------------------------------------------------------------------
def _roll_probe_kernel(x_ref, o_ref):
    o_ref[...] = pltpu.roll(x_ref[...], 1, axis=1)


def _detect_roll_sign():
    """Returns sign s.t. pltpu.roll(v, (sign*d) % m, axis=1)[:, p] == v[:, (p+d) % m]."""
    x = jnp.arange(128, dtype=jnp.float32)[None, :] * jnp.ones((8, 1), jnp.float32)
    y = pl.pallas_call(
        _roll_probe_kernel,
        out_shape=jax.ShapeDtypeStruct((8, 128), jnp.float32),
        grid=(1,),
        in_specs=[pl.BlockSpec((8, 128), lambda i: (0, 0))],
        out_specs=pl.BlockSpec((8, 128), lambda i: (0, 0)),
    )(x)
    first = float(jax.device_get(y)[0, 0])
    # jnp.roll convention (out[p] == in[(p-shift) % n]): out[0] == 127 -> sign = -1
    return -1 if first > 64.0 else 1


# --------------------------------------------------------------------------
# fully fused network kernel
# --------------------------------------------------------------------------
def _fused_cnn_kernel(roll_sign, height, width,
                      x_ref, w1_ref, w2_ref, w3_ref, w4_ref, w5_ref,
                      fc1w_ref, fc1b_ref, fc2w_ref, fc2b_ref, o_ref):
    m = x_ref.shape[1]                 # flat pixels in this batch block = nb*H*W
    img = height * width
    nb = m // img                      # images in this block
    log2_w = width.bit_length() - 1    # width is a power of two

    def shift_lanes(v, d):
        # shifted[:, p] == v[:, (p + d) % m]
        if d == 0:
            return v
        return pltpu.roll(v, (roll_sign * d) % m, axis=1)

    # per-lane (y, x) coordinates inside each image (power-of-two bit tricks)
    col = lax.broadcasted_iota(jnp.int32, (1, m), 1)
    x0 = jnp.bitwise_and(col, width - 1)
    y0 = jnp.bitwise_and(jnp.right_shift(col, log2_w), height - 1)

    act = x_ref[...]                   # (Cin, m) f32, valid on the stride-1 grid

    for layer, w_ref in enumerate((w1_ref, w2_ref, w3_ref, w4_ref, w5_ref)):
        s = 1 << layer                 # stride of the currently valid sub-grid
        # hoisted boundary masks: 4 compares per layer, AND-ed per tap
        y_ok = (y0 >= s, None, y0 < height - s)     # indexed by dy + 1
        x_ok = (x0 >= s, None, x0 < width - s)      # indexed by dx + 1
        taps = []
        for dy in (-1, 0, 1):
            for dx in (-1, 0, 1):
                t = shift_lanes(act, (dy * width + dx) * s)
                vy, vx = y_ok[dy + 1], x_ok[dx + 1]
                if vy is not None and vx is not None:
                    t = jnp.where(jnp.logical_and(vy, vx), t, 0.0)
                elif vy is not None:
                    t = jnp.where(vy, t, 0.0)
                elif vx is not None:
                    t = jnp.where(vx, t, 0.0)
                taps.append(t)
        # one fused K = 9*Cin matmul per layer (single MXU job instead of nine)
        stacked = jnp.concatenate(taps, axis=0).astype(jnp.bfloat16)   # (9*Cin, m)
        acc = jnp.dot(w_ref[...], stacked,
                      preferred_element_type=jnp.float32)              # (Cout, m)
        z = jnp.maximum(acc, 0.0)                            # ReLU
        t1 = jnp.maximum(z, shift_lanes(z, s))               # max over x-pair
        act = jnp.maximum(t1, shift_lanes(t1, s * width))    # max over y-pair

    # After 5 pools only lane n*H*W of each image is valid -> static lane slices.
    feats = jnp.concatenate(
        [act[:, n * img:n * img + 1] for n in range(nb)], axis=1)      # (Cout, nb)

    h = jnp.dot(fc1w_ref[...], feats.astype(jnp.bfloat16),
                preferred_element_type=jnp.float32) + fc1b_ref[...]    # (Dd, nb)
    h = jnp.maximum(h, 0.0)
    logits = jnp.dot(fc2w_ref[...], h.astype(jnp.bfloat16),
                     preferred_element_type=jnp.float32) + fc2b_ref[...]  # (10, nb)
    mx = jnp.max(logits, axis=0, keepdims=True)
    e = jnp.exp(logits - mx)
    o_ref[0] = e / jnp.sum(e, axis=0, keepdims=True)


# --------------------------------------------------------------------------
# wrapper
# --------------------------------------------------------------------------
def _pick_images_per_step(n):
    # Amortize per-grid-step overhead (target 8-16 images/step) while keeping
    # at least 2 grid steps so v7x's second TensorCore gets work.
    for nb in (16, 8, 4, 2, 1):
        if n % nb == 0 and n // nb >= 2:
            return nb
    return n                            # tiny batch: single grid step


def make_model_forward():
    roll_sign = _detect_roll_sign()

    @jax.jit
    def model_forward(x_nchw, params):
        n, cin, height, width = x_nchw.shape
        # TODO(synk): general image sizes; this fused kernel assumes the 32x32
        # power-of-two case where 5 rounds of 2x2 pooling end at 1x1 spatial.
        assert height == 32 and width == 32
        img = height * width
        nb = _pick_images_per_step(n)

        num_filters = params["convs"][0].shape[3]
        cpad = _round_up(cin, 8)        # keep channel dims sublane-tile aligned
        fpad = _round_up(num_filters, 8)
        ncls = params["w2"].shape[1]
        dd = params["w1"].shape[1]

        # activations: channels on sublanes, flat (image-major) pixels on lanes
        x = x_nchw.astype(jnp.float32).transpose(1, 0, 2, 3).reshape(cin, n * img)
        x = jnp.pad(x, ((0, cpad - cin), (0, 0)))

        # conv weights: (3,3,Cin,Cout) -> (Cout_pad, 9*Cin_pad) fused-tap matrices
        conv_ws = []
        c_in = cpad
        for w in params["convs"]:
            wcin, wcout = w.shape[2], w.shape[3]
            w = jnp.pad(w, ((0, 0), (0, 0), (0, c_in - wcin), (0, fpad - wcout)))
            conv_ws.append(w.reshape(9 * c_in, fpad).T.astype(jnp.bfloat16))
            c_in = fpad

        fc1w = jnp.pad(params["w1"], ((0, fpad - num_filters), (0, 0)))
        fc1w = fc1w.T.astype(jnp.bfloat16)                       # (Dd, fpad)
        fc1b = params["b1"].reshape(dd, 1).astype(jnp.float32)   # (Dd, 1)
        fc2w = params["w2"].T.astype(jnp.bfloat16)               # (ncls, Dd)
        fc2b = params["b2"].reshape(ncls, 1).astype(jnp.float32)  # (ncls, 1)

        kernel = functools.partial(_fused_cnn_kernel, roll_sign, height, width)
        in_specs = [pl.BlockSpec((cpad, nb * img), lambda b: (0, b))]
        in_specs += [pl.BlockSpec(w.shape, lambda b: (0, 0)) for w in conv_ws]
        in_specs += [pl.BlockSpec(fc1w.shape, lambda b: (0, 0)),
                     pl.BlockSpec(fc1b.shape, lambda b: (0, 0)),
                     pl.BlockSpec(fc2w.shape, lambda b: (0, 0)),
                     pl.BlockSpec(fc2b.shape, lambda b: (0, 0))]
        out = pl.pallas_call(
            kernel,
            out_shape=jax.ShapeDtypeStruct((n // nb, ncls, nb), jnp.float32),
            grid=(n // nb,),
            in_specs=in_specs,
            out_specs=pl.BlockSpec((1, ncls, nb), lambda b: (b, 0, 0)),
            compiler_params=pltpu.CompilerParams(
                dimension_semantics=("parallel",),
                vmem_limit_bytes=32 * 1024 * 1024),
        )(x, *conv_ws, fc1w, fc1b, fc2w, fc2b)
        return out.transpose(0, 2, 1).reshape(n, ncls)
    return model_forward


# --------------------------------------------------------------------------
# params + pure-JAX reference (for correctness verification)
# --------------------------------------------------------------------------
def init_params(key, in_channels, num_filters, neurons_dense, image_hw):
    keys = jax.random.split(key, 9)
    convs = []
    cin = in_channels
    for i in range(5):
        convs.append(0.1 * jax.random.normal(
            keys[i], (3, 3, cin, num_filters), jnp.float32))
        cin = num_filters
    h, w = image_hw
    for _ in range(5):
        h, w = h // 2, w // 2
    fc1_in = num_filters * h * w
    w1 = 0.1 * jax.random.normal(keys[5], (fc1_in, neurons_dense), jnp.float32)
    b1 = 0.1 * jax.random.normal(keys[6], (1, neurons_dense), jnp.float32)
    w2 = 0.1 * jax.random.normal(keys[7], (neurons_dense, 10), jnp.float32)
    b2 = 0.1 * jax.random.normal(keys[8], (1, 10), jnp.float32)
    return dict(convs=convs, w1=w1, b1=b1, w2=w2, b2=b2)


def reference_forward(x_nchw, params):
    # TODO(synk): the PyTorch module takes `activation` as a parameter; ReLU assumed.
    x = jnp.transpose(x_nchw, (0, 2, 3, 1)).astype(jnp.float32)
    for w in params["convs"]:
        x = lax.conv_general_dilated(
            x, w, window_strides=(1, 1), padding="SAME",
            dimension_numbers=("NHWC", "HWIO", "NHWC"))
        x = jnp.maximum(x, 0.0)
        n, h, wd, c = x.shape
        x = x.reshape(n, h // 2, 2, wd // 2, 2, c).max(axis=(2, 4))
    feats = jnp.transpose(x, (0, 3, 1, 2)).reshape(x.shape[0], -1)
    h1 = jnp.maximum(feats @ params["w1"] + params["b1"], 0.0)
    logits = h1 @ params["w2"] + params["b2"]
    return jax.nn.softmax(logits, axis=-1)


# --------------------------------------------------------------------------
if __name__ == "__main__":
    key = jax.random.PRNGKey(0)
    k_x, k_p = jax.random.split(key)
    N, C, H, W = 4, 3, 32, 32          # 32x32 survives 5 rounds of 2x2 pooling
    x = jax.random.normal(k_x, (N, C, H, W), jnp.float32)
    params = init_params(k_p, in_channels=C, num_filters=8,
                         neurons_dense=32, image_hw=(H, W))

    forward = make_model_forward()

    out = jax.block_until_ready(forward(x, params))
    ref = jax.block_until_ready(reference_forward(x, params))

    assert out.shape == (N, 10)
    assert bool(jnp.all(jnp.isfinite(out)))
    assert bool(jnp.allclose(jnp.sum(out, axis=1), 1.0, atol=1e-3))
    max_diff = float(jnp.max(jnp.abs(out - ref)))
    assert max_diff < 3e-2, f"mismatch vs reference, max diff {max_diff}"
    print("KERNEL_OK")
</pallas_src>

<mosaic_0001>
module attributes {stable_mosaic.version = 11 : i64} {
  func.func @_roll_probe_kernel(%arg0: i32, %arg1: memref<8x128xf32, #tpu.memory_space<vmem>>, %arg2: memref<8x128xf32, #tpu.memory_space<vmem>>) attributes {dimension_semantics = [#tpu.dimension_semantics<arbitrary>], iteration_bounds = array<i64: 1>, scalar_prefetch = 0 : i64, scratch_operands = 0 : i64, tpu.core_type = #tpu.core_type<tc>, window_params = [{pipeline_mode = #tpu.pipeline_mode<synchronous>, transform_indices = @transform_0, window_bounds = array<i64: 8, 128>}, {pipeline_mode = #tpu.pipeline_mode<synchronous>, transform_indices = @transform_1, window_bounds = array<i64: 8, 128>}]} {
    %c0 = arith.constant 0 : index
    %c0_0 = arith.constant 0 : index
    %0 = vector.load %arg1[%c0, %c0_0] : memref<8x128xf32, #tpu.memory_space<vmem>>, vector<8x128xf32>
    %c1_i32 = arith.constant 1 : i32
    %1 = tpu.dynamic_rotate %0 by %c1_i32 dim 1 : vector<8x128xf32>, i32 -> vector<8x128xf32>
    %c0_1 = arith.constant 0 : index
    %c0_2 = arith.constant 0 : index
    %2 = vector.load %arg2[%c0_1, %c0_2] : memref<8x128xf32, #tpu.memory_space<vmem>>, vector<8x128xf32>
    tpu.vector_store %arg2[%c0_1, %c0_2], %1 {strides = array<i32>} : memref<8x128xf32, #tpu.memory_space<vmem>>, vector<8x128xf32>,
    return
  }
  func.func @transform_0(%arg0: i32) -> (i32, i32) {
    %c0_i32 = arith.constant 0 : i32
    %c0_i32_0 = arith.constant 0 : i32
    %c0_i32_1 = arith.constant 0 : i32
    return %c0_i32, %c0_i32_0 : i32, i32
  }
  func.func @transform_1(%arg0: i32) -> (i32, i32) {
    %c0_i32 = arith.constant 0 : i32
    %c0_i32_0 = arith.constant 0 : i32
    %c0_i32_1 = arith.constant 0 : i32
    return %c0_i32, %c0_i32_0 : i32, i32
  }
}

</mosaic_0001>

<bundles_post_ra>
// kernel: tpu_custom_call.1
= control target key start
LH: loop header
LB: loop body
LE: loop exit
PB: predicated region body
PF: predicated region fallthrough
CT: control target
= control target key end

     0   :  { %6 = vsyncpa [#allocation3], 0  ;;  %s118_s0 = inlined_call_operand.hbm [shape: f32[8,128], index: 0, kind: input, shape index: {}]   ;;  %s119_s1 = inlined_call_operand.hbm [shape: f32[8,128], index: 1, kind: output, shape index: {}]  }
   0x1   :  { %7 = vsyncpa [#allocation4], 0  ;;  %s13_s8 = sshll.u32 %s118_s0, 4  ;;  %s99_s9 = smov [#allocation2]   ;;  %s14_s8 = int_to_ptr.hbm [resolvable:$true] %s13_s8 }
   0x2   :  { %s15_s10 = sshll.u32 %s99_s9, 4  ;;  %s16_s10 = int_to_ptr.vmem [resolvable:$true] %s15_s10 }
   0x3   :  { %18 = dma.hbm_to_vmem [thread:$0]  %s14_s8, 128, %s16_s10, [#allocation3]  }
   0x4   :  { %95 = dma.done.wait [#allocation3], 128  }
   0x5   :  { %96 = vsyncadd [#allocation3], 4294967168  ;;  %v23_v0 = vld [vmem:[#allocation2] sm:$0xff]  ;;  %s100_s11 = smov 1   ;;  %s101_s12 = smov [#allocation5]  }
   0x6   :  { %24 = vrot.lane.b32.xlu0 %v23_v0, %s100_s11  ;;  %s32_s13 = sshll.u32 %s101_s12, 4  ;;  %s34_s16 = sshll.u32 %s119_s1, 4  ;;  %s33_s13 = int_to_ptr.vmem [resolvable:$true] %s32_s13  ;;  %s35_s16 = int_to_ptr.hbm [resolvable:$true] %s34_s16 }
  0x78   :  { %v25_v1 = vpop.permute.xlu0 %24 }
  0x79   :  { %26 = vst [vmem:[#allocation5] sm:$0xff] %v25_v1 }
  0x7a   :  { %37 = dma.vmem_to_hbm [thread:$0]  %s33_s13, 128, %s35_s16, [#allocation4]  }
  0x7b   :  { %97 = dma.done.wait [#allocation4], 128  }
  0x7c   :  { %98 = vsyncadd [#allocation4], 4294967168 }
  0x7d   :  { %42 = vsyncpa [#allocation3], 1 }
  0x7e   :  { %43 = vsyncpa [#allocation4], 1 }

</bundles_post_ra>
